<compile_context>
chip_gen: v5e
topology: v5e:2x2
jax: 0.10.0
libtpu: 0.0.40
codegen_flags: <defaults>
</compile_context>

<pallas_src>
import math
import functools

import jax
import jax.numpy as jnp
from jax.experimental import pallas as pl
from jax.experimental.pallas import tpu as pltpu


def _mha_kernel(num_heads, head_dim, block_b, block_q, seq_len, embed_dim,
                x_ref, wqkv_ref, bqkv_ref, wo_ref, bo_ref, gamma_ref, beta_ref,
                out_ref, attn_ref, qkv_scr, ctx_scr):
    H, D, Bb, Tq, S, E = num_heads, head_dim, block_b, block_q, seq_len, embed_dim
    qi = pl.program_id(1)

    # ---- Once per batch block: fused QKV projection for the FULL sequence. ----------
    # (1/sqrt(D) is pre-folded into the q columns of wqkv / bqkv by to_kernel_params.)
    @pl.when(qi == 0)
    def _():
        x_all = x_ref[...].reshape(Bb * S, E).astype(jnp.bfloat16)
        qkv = jnp.dot(x_all, wqkv_ref[...], preferred_element_type=jnp.float32)
        qkv = qkv + bqkv_ref[...]                                  # [Bb*S, 3E], f32
        qkv_scr[...] = qkv.reshape(Bb, S, 3 * E).astype(jnp.bfloat16)

    q0 = pl.multiple_of(qi * Tq, Tq)
    q_tile = qkv_scr[:, pl.ds(q0, Tq), 0:E]                        # (Bb, Tq, E) bf16

    # Heavy projections are hoisted out of this loop; the per-head remainder is only the
    # small attention core.  Per-head contexts are assembled lane-dense in bf16 VMEM
    # scratch so the output projection is a single K=E matmul.
    for h in range(H):
        qh = q_tile[:, :, h * D:(h + 1) * D]                       # (Bb, Tq, D) bf16
        kh = qkv_scr[:, :, E + h * D:E + (h + 1) * D]              # (Bb, S,  D) bf16
        vh = qkv_scr[:, :, 2 * E + h * D:2 * E + (h + 1) * D]      # (Bb, S,  D) bf16

        s = jnp.einsum("bqd,bkd->bqk", qh, kh,
                       preferred_element_type=jnp.float32)         # (Bb, Tq, S), f32
        s = s - jnp.max(s, axis=-1, keepdims=True)                 # softmax kept in f32
        e = jnp.exp(s)
        p = e * pl.reciprocal(jnp.sum(e, axis=-1, keepdims=True), approx=True)

        # Direct per-head store (no stack): bounds live ranges, bf16 writeback.
        attn_ref[:, h] = p.astype(attn_ref.dtype)
        # dropout(attn_weights): identity in eval mode

        ctx = jnp.einsum("bqk,bkd->bqd", p.astype(jnp.bfloat16), vh,
                         preferred_element_type=jnp.float32)       # (Bb, Tq, D)
        ctx_scr[:, h * D:(h + 1) * D] = ctx.reshape(Bb * Tq, D).astype(jnp.bfloat16)

    # ---- Single lane-dense output projection: [Bb*Tq, E] @ [E, E] (f32 acc). --------
    out = jnp.dot(ctx_scr[...], wo_ref[...],
                  preferred_element_type=jnp.float32) + bo_ref[...]
    # dropout(output): identity in eval mode

    # Residual + LayerNorm (f32); x is re-read here instead of kept live across matmuls.
    x_tile = x_ref[:, pl.ds(q0, Tq), :].reshape(Bb * Tq, E).astype(jnp.float32)
    y = x_tile + out
    mean = jnp.mean(y, axis=-1, keepdims=True)
    var = jnp.mean((y - mean) ** 2, axis=-1, keepdims=True)
    y = (y - mean) * jax.lax.rsqrt(var + 1e-5)
    y = y * gamma_ref[...] + beta_ref[...]
    out_ref[...] = y.reshape(Bb, Tq, E).astype(out_ref.dtype)


def mha_pallas(x, kparams, num_heads, block_b=1, block_q=None,
               attn_dtype=jnp.bfloat16):
    """block_b / block_q should be chosen so block_b*block_q is a multiple of 256
    (v6e/v7x MXU rows; 128 on v5e) for production shapes, while keeping
    B//block_b >= 2 on v7x so both TensorCores get work."""
    B, S, E = x.shape
    assert E % num_heads == 0 and B % block_b == 0
    if block_q is None:
        block_q = min(S, 128)
    assert S % block_q == 0
    D = E // num_heads
    wqkv, bqkv, wo, bo, gamma, beta = kparams

    kernel = functools.partial(_mha_kernel, num_heads, D, block_b, block_q, S, E)

    in_specs = [
        pl.BlockSpec((block_b, S, E), lambda b, q: (b, 0, 0)),     # x (full seq per block)
        pl.BlockSpec((E, 3 * E), lambda b, q: (0, 0)),             # wqkv (bf16, q-scaled)
        pl.BlockSpec((1, 3 * E), lambda b, q: (0, 0)),             # bqkv
        pl.BlockSpec((E, E), lambda b, q: (0, 0)),                 # wo   (bf16)
        pl.BlockSpec((1, E), lambda b, q: (0, 0)),                 # bo
        pl.BlockSpec((1, E), lambda b, q: (0, 0)),                 # gamma
        pl.BlockSpec((1, E), lambda b, q: (0, 0)),                 # beta
    ]
    out_specs = (
        pl.BlockSpec((block_b, block_q, E), lambda b, q: (b, q, 0)),
        pl.BlockSpec((block_b, num_heads, block_q, S), lambda b, q: (b, 0, q, 0)),
    )
    out_shape = (
        jax.ShapeDtypeStruct((B, S, E), jnp.float32),
        jax.ShapeDtypeStruct((B, num_heads, S, S), attn_dtype),
    )

    # ---- VMEM budget: double-buffered I/O blocks + scratch + live f32 temporaries. ----
    f32b = 4
    attn_b = jnp.dtype(attn_dtype).itemsize
    m_full, m_tile = block_b * S, block_b * block_q
    io_bytes = 2 * (                                               # pipeline double-buffers
        block_b * S * E * x.dtype.itemsize                         # x block
        + m_tile * E * f32b                                        # out block
        + block_b * num_heads * block_q * S * attn_b               # attn block
        + wqkv.size * wqkv.dtype.itemsize + wo.size * wo.dtype.itemsize
        + (bqkv.size + bo.size + gamma.size + beta.size) * f32b
    )
    scratch_bytes = block_b * S * 3 * E * 2 + m_tile * E * 2       # bf16 qkv + ctx scratch
    temp_bytes = (
        m_full * 3 * E * f32b                                      # f32 qkv (qi==0 step)
        + 2 * block_b * block_q * S * f32b                         # per-head scores/probs
        + 3 * m_tile * E * f32b                                    # x_tile / out / y at LN
    )
    block_bytes = io_bytes + scratch_bytes + temp_bytes
    try:                                                           # per-generation cap
        vmem_cap = int(pltpu.get_tpu_info().vmem_capacity_bytes)
    except Exception:
        vmem_cap = 64 * 1024 * 1024
    vmem_limit = int(min(0.85 * vmem_cap,
                         max(4 * 1024 * 1024, 1.3 * block_bytes)))

    return pl.pallas_call(
        kernel,
        grid=(B // block_b, S // block_q),
        in_specs=in_specs,
        out_specs=out_specs,
        out_shape=out_shape,
        scratch_shapes=[
            pltpu.VMEM((block_b, S, 3 * E), jnp.bfloat16),         # qkv scratch (persists)
            pltpu.VMEM((block_b * block_q, E), jnp.bfloat16),      # per-tile context
        ],
        compiler_params=pltpu.CompilerParams(
            # qi axis must stay "arbitrary": qkv scratch is filled at qi==0 and reused.
            dimension_semantics=("parallel", "arbitrary"),
            vmem_limit_bytes=vmem_limit,
        ),
    )(x, wqkv, bqkv, wo, bo, gamma, beta)


# ------------------------- parameter setup (plain JAX glue) -------------------------

def spectral_normalize(w, n_iter=50):
    """Divide w ([out, in], PyTorch Linear layout) by its largest singular value."""
    u = jnp.ones((w.shape[0],), w.dtype)
    u = u / jnp.linalg.norm(u)
    v = jnp.zeros((w.shape[1],), w.dtype)
    for _ in range(n_iter):
        v = w.T @ u
        v = v / (jnp.linalg.norm(v) + 1e-12)
        u = w @ v
        u = u / (jnp.linalg.norm(u) + 1e-12)
    sigma = u @ (w @ v)
    return w / sigma


def init_params(key, embed_dim):
    """PyTorch-layout params: Linear weights [out, in], biases [out]."""
    keys = jax.random.split(key, 8)
    bound = 1.0 / math.sqrt(embed_dim)

    def lin(kw, kb):
        w = jax.random.uniform(kw, (embed_dim, embed_dim), jnp.float32, -bound, bound)
        b = jax.random.uniform(kb, (embed_dim,), jnp.float32, -bound, bound)
        return w, b

    wq, bq = lin(keys[0], keys[1])
    wk, bk = lin(keys[2], keys[3])
    wv, bv = lin(keys[4], keys[5])
    wo, bo = lin(keys[6], keys[7])
    wq, wk, wv = spectral_normalize(wq), spectral_normalize(wk), spectral_normalize(wv)
    gamma = jnp.ones((embed_dim,), jnp.float32)
    beta = jnp.zeros((embed_dim,), jnp.float32)
    return wq, bq, wk, bk, wv, bv, wo, bo, gamma, beta


def to_kernel_params(raw, num_heads, mxu_dtype=jnp.bfloat16):
    """Pack weights for the kernel: wqkv [E, 3E] (x @ wqkv == [q|k|v]), wo [E, E].
    1/sqrt(head_dim) is folded into the q columns (one-time weight prep, zero kernel cost)."""
    wq, bq, wk, bk, wv, bv, wo, bo, gamma, beta = raw
    E = wq.shape[0]
    scale = 1.0 / math.sqrt(E // num_heads)
    wqkv = jnp.concatenate([wq.T * scale, wk.T, wv.T], axis=1).astype(mxu_dtype)  # [E, 3E]
    bqkv = jnp.concatenate([bq * scale, bk, bv])[None, :].astype(jnp.float32)     # [1, 3E]
    wo_k = wo.T.astype(mxu_dtype)                                                 # [E, E]
    return (wqkv, bqkv, wo_k,
            bo[None, :].astype(jnp.float32),
            gamma[None, :].astype(jnp.float32),
            beta[None, :].astype(jnp.float32))


def reference(x, raw, num_heads):
    """Pure-JAX f32 replica of the PyTorch forward (eval mode, mask=None)."""
    wq, bq, wk, bk, wv, bv, wo, bo, gamma, beta = raw
    B, S, E = x.shape
    D = E // num_heads

    def lin(t, w, b):
        return t @ w.T + b

    def heads(t):
        return t.reshape(B, S, num_heads, D).transpose(0, 2, 1, 3)

    q, k, v = heads(lin(x, wq, bq)), heads(lin(x, wk, bk)), heads(lin(x, wv, bv))
    scores = jnp.einsum("bhqd,bhkd->bhqk", q, k) / math.sqrt(D)
    attn = jax.nn.softmax(scores, axis=-1)
    ctx = jnp.einsum("bhqk,bhkd->bhqd", attn, v).transpose(0, 2, 1, 3).reshape(B, S, E)
    out = lin(ctx, wo, bo)
    y = x + out
    mean = jnp.mean(y, axis=-1, keepdims=True)
    var = jnp.mean((y - mean) ** 2, axis=-1, keepdims=True)
    y = (y - mean) / jnp.sqrt(var + 1e-5) * gamma + beta
    return y, attn


if __name__ == "__main__":
    B, S, E, H = 2, 8, 32, 4

    key = jax.random.PRNGKey(0)
    kx, kp = jax.random.split(key)
    x = jax.random.normal(kx, (B, S, E), jnp.float32)
    raw = init_params(kp, E)
    kparams = to_kernel_params(raw, H)

    # block_b=1 -> batch grid axis has 2 independent "parallel" steps (both v7x TCs busy);
    # block_q defaults to min(S, 128) = S here, so there is a single q-tile per batch block.
    out, attn = mha_pallas(x, kparams, H, block_b=1)
    out, attn = jax.block_until_ready((out, attn))

    ref_out, ref_attn = reference(x, raw, H)
    assert out.shape == (B, S, E) and attn.shape == (B, H, S, S)
    # Tolerances loosened for bf16 MXU operands + bf16 attn output (f32 accumulation,
    # f32 softmax/LayerNorm, EUP approx reciprocal in the softmax denominator).
    assert jnp.allclose(out, ref_out, atol=5e-2, rtol=5e-2)
    assert jnp.allclose(attn.astype(jnp.float32), ref_attn, atol=2e-2, rtol=2e-2)

    print("KERNEL_OK")
</pallas_src>

<mosaic_0001>
module attributes {stable_mosaic.version = 11 : i64} {
  func.func @_mha_kernel(%arg0: i32, %arg1: i32, %arg2: memref<1x8x32xf32, #tpu.memory_space<vmem>>, %arg3: memref<32x96xbf16, #tpu.memory_space<vmem>>, %arg4: memref<1x96xf32, #tpu.memory_space<vmem>>, %arg5: memref<32x32xbf16, #tpu.memory_space<vmem>>, %arg6: memref<1x32xf32, #tpu.memory_space<vmem>>, %arg7: memref<1x32xf32, #tpu.memory_space<vmem>>, %arg8: memref<1x32xf32, #tpu.memory_space<vmem>>, %arg9: memref<1x8x32xf32, #tpu.memory_space<vmem>>, %arg10: memref<1x4x8x8xbf16, #tpu.memory_space<vmem>>, %arg11: memref<1x8x96xbf16, #tpu.memory_space<vmem>>, %arg12: memref<8x32xbf16, #tpu.memory_space<vmem>>) attributes {dimension_semantics = [#tpu.dimension_semantics<parallel>, #tpu.dimension_semantics<arbitrary>], iteration_bounds = array<i64: 2, 1>, scalar_prefetch = 0 : i64, scratch_operands = 2 : i64, tpu.core_type = #tpu.core_type<tc>, window_params = [{transform_indices = @transform_0, window_bounds = array<i64: 1, 8, 32>}, {pipeline_mode = #tpu.pipeline_mode<synchronous>, transform_indices = @transform_1, window_bounds = array<i64: 32, 96>}, {pipeline_mode = #tpu.pipeline_mode<synchronous>, transform_indices = @transform_2, window_bounds = array<i64: 1, 96>}, {pipeline_mode = #tpu.pipeline_mode<synchronous>, transform_indices = @transform_3, window_bounds = array<i64: 32, 32>}, {pipeline_mode = #tpu.pipeline_mode<synchronous>, transform_indices = @transform_4, window_bounds = array<i64: 1, 32>}, {pipeline_mode = #tpu.pipeline_mode<synchronous>, transform_indices = @transform_5, window_bounds = array<i64: 1, 32>}, {pipeline_mode = #tpu.pipeline_mode<synchronous>, transform_indices = @transform_6, window_bounds = array<i64: 1, 32>}, {transform_indices = @transform_7, window_bounds = array<i64: 1, 8, 32>}, {transform_indices = @transform_8, window_bounds = array<i64: 1, 4, 8, 8>}]} {
    %c0_i32 = arith.constant 0 : i32
    %0 = arith.cmpi eq, %arg1, %c0_i32 : i32
    %1 = arith.extui %0 : i1 to i32
    %c0_i32_0 = arith.constant 0 : i32
    %2 = arith.cmpi ne, %1, %c0_i32_0 : i32
    scf.if %2 {
      %c0_72 = arith.constant 0 : index
      %c0_73 = arith.constant 0 : index
      %c0_74 = arith.constant 0 : index
      %135 = vector.load %arg2[%c0_72, %c0_73, %c0_74] : memref<1x8x32xf32, #tpu.memory_space<vmem>>, vector<1x8x32xf32>
      %136 = vector.shape_cast %135 : vector<1x8x32xf32> to vector<8x32xf32>
      %137 = arith.truncf %136 : vector<8x32xf32> to vector<8x32xbf16>
      %c0_75 = arith.constant 0 : index
      %c0_76 = arith.constant 0 : index
      %138 = vector.load %arg3[%c0_75, %c0_76] : memref<32x96xbf16, #tpu.memory_space<vmem>>, vector<32x96xbf16>
      %cst_77 = arith.constant dense<0.000000e+00> : vector<8x96xf32>
      %139 = tpu.matmul %137, %138, %cst_77 {dimension_numbers = #tpu.dot_dimension_numbers<[1], [0], [0], [1], [0, 0, 1, 1], [], []>} : vector<8x32xbf16>, vector<32x96xbf16>, vector<8x96xf32> -> vector<8x96xf32>
      %c0_78 = arith.constant 0 : index
      %c0_79 = arith.constant 0 : index
      %140 = vector.load %arg4[%c0_78, %c0_79] : memref<1x96xf32, #tpu.memory_space<vmem>>, vector<1x96xf32>
      %141 = vector.broadcast %140 : vector<1x96xf32> to vector<8x96xf32>
      %142 = arith.addf %139, %141 : vector<8x96xf32>
      %143 = vector.shape_cast %142 : vector<8x96xf32> to vector<1x8x96xf32>
      %144 = arith.truncf %143 : vector<1x8x96xf32> to vector<1x8x96xbf16>
      %c0_80 = arith.constant 0 : index
      %c0_81 = arith.constant 0 : index
      %c0_82 = arith.constant 0 : index
      %145 = vector.load %arg11[%c0_80, %c0_81, %c0_82] : memref<1x8x96xbf16, #tpu.memory_space<vmem>>, vector<1x8x96xbf16>
      tpu.vector_store %arg11[%c0_80, %c0_81, %c0_82], %144 {strides = array<i32>} : memref<1x8x96xbf16, #tpu.memory_space<vmem>>, vector<1x8x96xbf16>,
    } else {
    }
    %c8_i32 = arith.constant 8 : i32
    %3 = arith.muli %arg1, %c8_i32 : i32
    %4 = tpu.assume_multiple %3, 8 : i32
    %c0 = arith.constant 0 : index
    %5 = arith.index_cast %4 : i32 to index
    %c0_1 = arith.constant 0 : index
    %6 = vector.load %arg11[%c0, %5, %c0_1] : memref<1x8x96xbf16, #tpu.memory_space<vmem>>, vector<1x8x32xbf16>
    %7 = vector.extract_strided_slice %6 {offsets = [0, 0, 0], sizes = [1, 8, 8], strides = [1, 1, 1]} : vector<1x8x32xbf16> to vector<1x8x8xbf16>
    %c0_2 = arith.constant 0 : index
    %c0_3 = arith.constant 0 : index
    %c32 = arith.constant 32 : index
    %8 = vector.load %arg11[%c0_2, %c0_3, %c32] : memref<1x8x96xbf16, #tpu.memory_space<vmem>>, vector<1x8x8xbf16>
    %c0_4 = arith.constant 0 : index
    %c0_5 = arith.constant 0 : index
    %c64 = arith.constant 64 : index
    %9 = vector.load %arg11[%c0_4, %c0_5, %c64] : memref<1x8x96xbf16, #tpu.memory_space<vmem>>, vector<1x8x8xbf16>
    "tpu.trace_start"() <{level = 10 : i32, message = "bqd,bkd->bqk"}> : () -> ()
    %cst = arith.constant dense<0.000000e+00> : vector<1x8x8xf32>
    %10 = tpu.matmul %7, %8, %cst {dimension_numbers = #tpu.dot_dimension_numbers<[2], [2], [1], [1], [0, 0, 0, 1, 1, 1], [0], [0]>} : vector<1x8x8xbf16>, vector<1x8x8xbf16>, vector<1x8x8xf32> -> vector<1x8x8xf32>
    "tpu.trace_stop"() : () -> ()
    %cst_6 = arith.constant dense<0xFF800000> : vector<1x8xf32>
    %11 = vector.multi_reduction <maximumf>, %10, %cst_6 [2] : vector<1x8x8xf32> to vector<1x8xf32>
    %12 = vector.shape_cast %11 : vector<1x8xf32> to vector<1x8x1xf32>
    %13 = vector.broadcast %12 : vector<1x8x1xf32> to vector<1x8x8xf32>
    %14 = arith.subf %10, %13 : vector<1x8x8xf32>
    %15 = math.exp %14 : vector<1x8x8xf32>
    %cst_7 = arith.constant dense<0.000000e+00> : vector<1x8xf32>
    %16 = vector.multi_reduction <add>, %15, %cst_7 [2] : vector<1x8x8xf32> to vector<1x8xf32>
    %17 = vector.shape_cast %16 : vector<1x8xf32> to vector<1x8x1xf32>
    %18 = tpu.reciprocal %17 {approx = true} : vector<1x8x1xf32> -> vector<1x8x1xf32>
    %19 = vector.broadcast %18 : vector<1x8x1xf32> to vector<1x8x8xf32>
    %20 = arith.mulf %15, %19 : vector<1x8x8xf32>
    %21 = arith.truncf %20 : vector<1x8x8xf32> to vector<1x8x8xbf16>
    %c0_8 = arith.constant 0 : index
    %c0_9 = arith.constant 0 : index
    %c0_10 = arith.constant 0 : index
    %c0_11 = arith.constant 0 : index
    %22 = vector.load %arg10[%c0_8, %c0_9, %c0_10, %c0_11] : memref<1x4x8x8xbf16, #tpu.memory_space<vmem>>, vector<1x1x8x8xbf16>
    %23 = vector.shape_cast %22 : vector<1x1x8x8xbf16> to vector<1x8x8xbf16>
    %24 = vector.shape_cast %21 : vector<1x8x8xbf16> to vector<1x1x8x8xbf16>
    tpu.vector_store %arg10[%c0_8, %c0_9, %c0_10, %c0_11], %24 {strides = array<i32>} : memref<1x4x8x8xbf16, #tpu.memory_space<vmem>>, vector<1x1x8x8xbf16>,
    %25 = arith.truncf %20 : vector<1x8x8xf32> to vector<1x8x8xbf16>
    "tpu.trace_start"() <{level = 10 : i32, message = "bqk,bkd->bqd"}> : () -> ()
    %cst_12 = arith.constant dense<0.000000e+00> : vector<1x8x8xf32>
    %26 = tpu.matmul %25, %9, %cst_12 {dimension_numbers = #tpu.dot_dimension_numbers<[2], [1], [1], [2], [0, 0, 0, 1, 1, 2], [0], [0]>} : vector<1x8x8xbf16>, vector<1x8x8xbf16>, vector<1x8x8xf32> -> vector<1x8x8xf32>
    "tpu.trace_stop"() : () -> ()
    %27 = vector.shape_cast %26 : vector<1x8x8xf32> to vector<8x8xf32>
    %28 = arith.truncf %27 : vector<8x8xf32> to vector<8x8xbf16>
    %c0_13 = arith.constant 0 : index
    %c0_14 = arith.constant 0 : index
    %29 = vector.load %arg12[%c0_13, %c0_14] : memref<8x32xbf16, #tpu.memory_space<vmem>>, vector<8x8xbf16>
    tpu.vector_store %arg12[%c0_13, %c0_14], %28 {strides = array<i32>} : memref<8x32xbf16, #tpu.memory_space<vmem>>, vector<8x8xbf16>,
    %30 = vector.extract_strided_slice %6 {offsets = [0, 0, 8], sizes = [1, 8, 8], strides = [1, 1, 1]} : vector<1x8x32xbf16> to vector<1x8x8xbf16>
    %c0_15 = arith.constant 0 : index
    %c0_16 = arith.constant 0 : index
    %c40 = arith.constant 40 : index
    %31 = vector.load %arg11[%c0_15, %c0_16, %c40] : memref<1x8x96xbf16, #tpu.memory_space<vmem>>, vector<1x8x8xbf16>
    %c0_17 = arith.constant 0 : index
    %c0_18 = arith.constant 0 : index
    %c72 = arith.constant 72 : index
    %32 = vector.load %arg11[%c0_17, %c0_18, %c72] : memref<1x8x96xbf16, #tpu.memory_space<vmem>>, vector<1x8x8xbf16>
    "tpu.trace_start"() <{level = 10 : i32, message = "bqd,bkd->bqk"}> : () -> ()
    %cst_19 = arith.constant dense<0.000000e+00> : vector<1x8x8xf32>
    %33 = tpu.matmul %30, %31, %cst_19 {dimension_numbers = #tpu.dot_dimension_numbers<[2], [2], [1], [1], [0, 0, 0, 1, 1, 1], [0], [0]>} : vector<1x8x8xbf16>, vector<1x8x8xbf16>, vector<1x8x8xf32> -> vector<1x8x8xf32>
    "tpu.trace_stop"() : () -> ()
    %cst_20 = arith.constant dense<0xFF800000> : vector<1x8xf32>
    %34 = vector.multi_reduction <maximumf>, %33, %cst_20 [2] : vector<1x8x8xf32> to vector<1x8xf32>
    %35 = vector.shape_cast %34 : vector<1x8xf32> to vector<1x8x1xf32>
    %36 = vector.broadcast %35 : vector<1x8x1xf32> to vector<1x8x8xf32>
    %37 = arith.subf %33, %36 : vector<1x8x8xf32>
    %38 = math.exp %37 : vector<1x8x8xf32>
    %cst_21 = arith.constant dense<0.000000e+00> : vector<1x8xf32>
    %39 = vector.multi_reduction <add>, %38, %cst_21 [2] : vector<1x8x8xf32> to vector<1x8xf32>
    %40 = vector.shape_cast %39 : vector<1x8xf32> to vector<1x8x1xf32>
    %41 = tpu.reciprocal %40 {approx = true} : vector<1x8x1xf32> -> vector<1x8x1xf32>
    %42 = vector.broadcast %41 : vector<1x8x1xf32> to vector<1x8x8xf32>
    %43 = arith.mulf %38, %42 : vector<1x8x8xf32>
    %44 = arith.truncf %43 : vector<1x8x8xf32> to vector<1x8x8xbf16>
    %c0_22 = arith.constant 0 : index
    %c1 = arith.constant 1 : index
    %c0_23 = arith.constant 0 : index
    %c0_24 = arith.constant 0 : index
    %45 = vector.load %arg10[%c0_22, %c1, %c0_23, %c0_24] : memref<1x4x8x8xbf16, #tpu.memory_space<vmem>>, vector<1x1x8x8xbf16>
    %46 = vector.shape_cast %45 : vector<1x1x8x8xbf16> to vector<1x8x8xbf16>
    %47 = vector.shape_cast %44 : vector<1x8x8xbf16> to vector<1x1x8x8xbf16>
    tpu.vector_store %arg10[%c0_22, %c1, %c0_23, %c0_24], %47 {strides = array<i32>} : memref<1x4x8x8xbf16, #tpu.memory_space<vmem>>, vector<1x1x8x8xbf16>,
    %48 = arith.truncf %43 : vector<1x8x8xf32> to vector<1x8x8xbf16>
    "tpu.trace_start"() <{level = 10 : i32, message = "bqk,bkd->bqd"}> : () -> ()
    %cst_25 = arith.constant dense<0.000000e+00> : vector<1x8x8xf32>
    %49 = tpu.matmul %48, %32, %cst_25 {dimension_numbers = #tpu.dot_dimension_numbers<[2], [1], [1], [2], [0, 0, 0, 1, 1, 2], [0], [0]>} : vector<1x8x8xbf16>, vector<1x8x8xbf16>, vector<1x8x8xf32> -> vector<1x8x8xf32>
    "tpu.trace_stop"() : () -> ()
    %50 = vector.shape_cast %49 : vector<1x8x8xf32> to vector<8x8xf32>
    %51 = arith.truncf %50 : vector<8x8xf32> to vector<8x8xbf16>
    %c0_26 = arith.constant 0 : index
    %c8 = arith.constant 8 : index
    %52 = vector.load %arg12[%c0_26, %c8] : memref<8x32xbf16, #tpu.memory_space<vmem>>, vector<8x8xbf16>
    tpu.vector_store %arg12[%c0_26, %c8], %51 {strides = array<i32>} : memref<8x32xbf16, #tpu.memory_space<vmem>>, vector<8x8xbf16>,
    %53 = vector.extract_strided_slice %6 {offsets = [0, 0, 16], sizes = [1, 8, 8], strides = [1, 1, 1]} : vector<1x8x32xbf16> to vector<1x8x8xbf16>
    %c0_27 = arith.constant 0 : index
    %c0_28 = arith.constant 0 : index
    %c48 = arith.constant 48 : index
    %54 = vector.load %arg11[%c0_27, %c0_28, %c48] : memref<1x8x96xbf16, #tpu.memory_space<vmem>>, vector<1x8x8xbf16>
    %c0_29 = arith.constant 0 : index
    %c0_30 = arith.constant 0 : index
    %c80 = arith.constant 80 : index
    %55 = vector.load %arg11[%c0_29, %c0_30, %c80] : memref<1x8x96xbf16, #tpu.memory_space<vmem>>, vector<1x8x8xbf16>
    "tpu.trace_start"() <{level = 10 : i32, message = "bqd,bkd->bqk"}> : () -> ()
    %cst_31 = arith.constant dense<0.000000e+00> : vector<1x8x8xf32>
    %56 = tpu.matmul %53, %54, %cst_31 {dimension_numbers = #tpu.dot_dimension_numbers<[2], [2], [1], [1], [0, 0, 0, 1, 1, 1], [0], [0]>} : vector<1x8x8xbf16>, vector<1x8x8xbf16>, vector<1x8x8xf32> -> vector<1x8x8xf32>
    "tpu.trace_stop"() : () -> ()
    %cst_32 = arith.constant dense<0xFF800000> : vector<1x8xf32>
    %57 = vector.multi_reduction <maximumf>, %56, %cst_32 [2] : vector<1x8x8xf32> to vector<1x8xf32>
    %58 = vector.shape_cast %57 : vector<1x8xf32> to vector<1x8x1xf32>
    %59 = vector.broadcast %58 : vector<1x8x1xf32> to vector<1x8x8xf32>
    %60 = arith.subf %56, %59 : vector<1x8x8xf32>
    %61 = math.exp %60 : vector<1x8x8xf32>
    %cst_33 = arith.constant dense<0.000000e+00> : vector<1x8xf32>
    %62 = vector.multi_reduction <add>, %61, %cst_33 [2] : vector<1x8x8xf32> to vector<1x8xf32>
    %63 = vector.shape_cast %62 : vector<1x8xf32> to vector<1x8x1xf32>
    %64 = tpu.reciprocal %63 {approx = true} : vector<1x8x1xf32> -> vector<1x8x1xf32>
    %65 = vector.broadcast %64 : vector<1x8x1xf32> to vector<1x8x8xf32>
    %66 = arith.mulf %61, %65 : vector<1x8x8xf32>
    %67 = arith.truncf %66 : vector<1x8x8xf32> to vector<1x8x8xbf16>
    %c0_34 = arith.constant 0 : index
    %c2 = arith.constant 2 : index
    %c0_35 = arith.constant 0 : index
    %c0_36 = arith.constant 0 : index
    %68 = vector.load %arg10[%c0_34, %c2, %c0_35, %c0_36] : memref<1x4x8x8xbf16, #tpu.memory_space<vmem>>, vector<1x1x8x8xbf16>
    %69 = vector.shape_cast %68 : vector<1x1x8x8xbf16> to vector<1x8x8xbf16>
    %70 = vector.shape_cast %67 : vector<1x8x8xbf16> to vector<1x1x8x8xbf16>
    tpu.vector_store %arg10[%c0_34, %c2, %c0_35, %c0_36], %70 {strides = array<i32>} : memref<1x4x8x8xbf16, #tpu.memory_space<vmem>>, vector<1x1x8x8xbf16>,
    %71 = arith.truncf %66 : vector<1x8x8xf32> to vector<1x8x8xbf16>
    "tpu.trace_start"() <{level = 10 : i32, message = "bqk,bkd->bqd"}> : () -> ()
    %cst_37 = arith.constant dense<0.000000e+00> : vector<1x8x8xf32>
    %72 = tpu.matmul %71, %55, %cst_37 {dimension_numbers = #tpu.dot_dimension_numbers<[2], [1], [1], [2], [0, 0, 0, 1, 1, 2], [0], [0]>} : vector<1x8x8xbf16>, vector<1x8x8xbf16>, vector<1x8x8xf32> -> vector<1x8x8xf32>
    "tpu.trace_stop"() : () -> ()
    %73 = vector.shape_cast %72 : vector<1x8x8xf32> to vector<8x8xf32>
    %74 = arith.truncf %73 : vector<8x8xf32> to vector<8x8xbf16>
    %c0_38 = arith.constant 0 : index
    %c16 = arith.constant 16 : index
    %75 = vector.load %arg12[%c0_38, %c16] : memref<8x32xbf16, #tpu.memory_space<vmem>>, vector<8x8xbf16>
    tpu.vector_store %arg12[%c0_38, %c16], %74 {strides = array<i32>} : memref<8x32xbf16, #tpu.memory_space<vmem>>, vector<8x8xbf16>,
    %76 = vector.extract_strided_slice %6 {offsets = [0, 0, 24], sizes = [1, 8, 8], strides = [1, 1, 1]} : vector<1x8x32xbf16> to vector<1x8x8xbf16>
    %c0_39 = arith.constant 0 : index
    %c0_40 = arith.constant 0 : index
    %c56 = arith.constant 56 : index
    %77 = vector.load %arg11[%c0_39, %c0_40, %c56] : memref<1x8x96xbf16, #tpu.memory_space<vmem>>, vector<1x8x8xbf16>
    %c0_41 = arith.constant 0 : index
    %c0_42 = arith.constant 0 : index
    %c88 = arith.constant 88 : index
    %78 = vector.load %arg11[%c0_41, %c0_42, %c88] : memref<1x8x96xbf16, #tpu.memory_space<vmem>>, vector<1x8x8xbf16>
    "tpu.trace_start"() <{level = 10 : i32, message = "bqd,bkd->bqk"}> : () -> ()
    %cst_43 = arith.constant dense<0.000000e+00> : vector<1x8x8xf32>
    %79 = tpu.matmul %76, %77, %cst_43 {dimension_numbers = #tpu.dot_dimension_numbers<[2], [2], [1], [1], [0, 0, 0, 1, 1, 1], [0], [0]>} : vector<1x8x8xbf16>, vector<1x8x8xbf16>, vector<1x8x8xf32> -> vector<1x8x8xf32>
    "tpu.trace_stop"() : () -> ()
    %cst_44 = arith.constant dense<0xFF800000> : vector<1x8xf32>
    %80 = vector.multi_reduction <maximumf>, %79, %cst_44 [2] : vector<1x8x8xf32> to vector<1x8xf32>
    %81 = vector.shape_cast %80 : vector<1x8xf32> to vector<1x8x1xf32>
    %82 = vector.broadcast %81 : vector<1x8x1xf32> to vector<1x8x8xf32>
    %83 = arith.subf %79, %82 : vector<1x8x8xf32>
    %84 = math.exp %83 : vector<1x8x8xf32>
    %cst_45 = arith.constant dense<0.000000e+00> : vector<1x8xf32>
    %85 = vector.multi_reduction <add>, %84, %cst_45 [2] : vector<1x8x8xf32> to vector<1x8xf32>
    %86 = vector.shape_cast %85 : vector<1x8xf32> to vector<1x8x1xf32>
    %87 = tpu.reciprocal %86 {approx = true} : vector<1x8x1xf32> -> vector<1x8x1xf32>
    %88 = vector.broadcast %87 : vector<1x8x1xf32> to vector<1x8x8xf32>
    %89 = arith.mulf %84, %88 : vector<1x8x8xf32>
    %90 = arith.truncf %89 : vector<1x8x8xf32> to vector<1x8x8xbf16>
    %c0_46 = arith.constant 0 : index
    %c3 = arith.constant 3 : index
    %c0_47 = arith.constant 0 : index
    %c0_48 = arith.constant 0 : index
    %91 = vector.load %arg10[%c0_46, %c3, %c0_47, %c0_48] : memref<1x4x8x8xbf16, #tpu.memory_space<vmem>>, vector<1x1x8x8xbf16>
    %92 = vector.shape_cast %91 : vector<1x1x8x8xbf16> to vector<1x8x8xbf16>
    %93 = vector.shape_cast %90 : vector<1x8x8xbf16> to vector<1x1x8x8xbf16>
    tpu.vector_store %arg10[%c0_46, %c3, %c0_47, %c0_48], %93 {strides = array<i32>} : memref<1x4x8x8xbf16, #tpu.memory_space<vmem>>, vector<1x1x8x8xbf16>,
    %94 = arith.truncf %89 : vector<1x8x8xf32> to vector<1x8x8xbf16>
    "tpu.trace_start"() <{level = 10 : i32, message = "bqk,bkd->bqd"}> : () -> ()
    %cst_49 = arith.constant dense<0.000000e+00> : vector<1x8x8xf32>
    %95 = tpu.matmul %94, %78, %cst_49 {dimension_numbers = #tpu.dot_dimension_numbers<[2], [1], [1], [2], [0, 0, 0, 1, 1, 2], [0], [0]>} : vector<1x8x8xbf16>, vector<1x8x8xbf16>, vector<1x8x8xf32> -> vector<1x8x8xf32>
    "tpu.trace_stop"() : () -> ()
    %96 = vector.shape_cast %95 : vector<1x8x8xf32> to vector<8x8xf32>
    %97 = arith.truncf %96 : vector<8x8xf32> to vector<8x8xbf16>
    %c0_50 = arith.constant 0 : index
    %c24 = arith.constant 24 : index
    %98 = vector.load %arg12[%c0_50, %c24] : memref<8x32xbf16, #tpu.memory_space<vmem>>, vector<8x8xbf16>
    tpu.vector_store %arg12[%c0_50, %c24], %97 {strides = array<i32>} : memref<8x32xbf16, #tpu.memory_space<vmem>>, vector<8x8xbf16>,
    %c0_51 = arith.constant 0 : index
    %c0_52 = arith.constant 0 : index
    %99 = vector.load %arg12[%c0_51, %c0_52] : memref<8x32xbf16, #tpu.memory_space<vmem>>, vector<8x32xbf16>
    %c0_53 = arith.constant 0 : index
    %c0_54 = arith.constant 0 : index
    %100 = vector.load %arg5[%c0_53, %c0_54] : memref<32x32xbf16, #tpu.memory_space<vmem>>, vector<32x32xbf16>
    %cst_55 = arith.constant dense<0.000000e+00> : vector<8x32xf32>
    %101 = tpu.matmul %99, %100, %cst_55 {dimension_numbers = #tpu.dot_dimension_numbers<[1], [0], [0], [1], [0, 0, 1, 1], [], []>} : vector<8x32xbf16>, vector<32x32xbf16>, vector<8x32xf32> -> vector<8x32xf32>
    %c0_56 = arith.constant 0 : index
    %c0_57 = arith.constant 0 : index
    %102 = vector.load %arg6[%c0_56, %c0_57] : memref<1x32xf32, #tpu.memory_space<vmem>>, vector<1x32xf32>
    %103 = vector.broadcast %102 : vector<1x32xf32> to vector<8x32xf32>
    %104 = arith.addf %101, %103 : vector<8x32xf32>
    %c0_58 = arith.constant 0 : index
    %105 = arith.index_cast %4 : i32 to index
    %c0_59 = arith.constant 0 : index
    %106 = vector.load %arg2[%c0_58, %105, %c0_59] : memref<1x8x32xf32, #tpu.memory_space<vmem>>, vector<1x8x32xf32>
    %107 = vector.shape_cast %106 : vector<1x8x32xf32> to vector<8x32xf32>
    %108 = arith.addf %107, %104 : vector<8x32xf32>
    %cst_60 = arith.constant dense<0.000000e+00> : vector<8xf32>
    %109 = vector.multi_reduction <add>, %108, %cst_60 [1] : vector<8x32xf32> to vector<8xf32>
    %110 = vector.shape_cast %109 : vector<8xf32> to vector<8x1xf32>
    %cst_61 = arith.constant 3.200000e+01 : f32
    %111 = vector.broadcast %cst_61 : f32 to vector<8x1xf32>
    %112 = arith.divf %110, %111 : vector<8x1xf32>
    %113 = vector.broadcast %112 : vector<8x1xf32> to vector<8x32xf32>
    %114 = arith.subf %108, %113 : vector<8x32xf32>
    %115 = arith.mulf %114, %114 : vector<8x32xf32>
    %cst_62 = arith.constant dense<0.000000e+00> : vector<8xf32>
    %116 = vector.multi_reduction <add>, %115, %cst_62 [1] : vector<8x32xf32> to vector<8xf32>
    %117 = vector.shape_cast %116 : vector<8xf32> to vector<8x1xf32>
    %cst_63 = arith.constant 3.200000e+01 : f32
    %118 = vector.broadcast %cst_63 : f32 to vector<8x1xf32>
    %119 = arith.divf %117, %118 : vector<8x1xf32>
    %120 = vector.broadcast %112 : vector<8x1xf32> to vector<8x32xf32>
    %121 = arith.subf %108, %120 : vector<8x32xf32>
    %cst_64 = arith.constant 9.99999974E-6 : f32
    %122 = vector.broadcast %cst_64 : f32 to vector<8x1xf32>
    %123 = arith.addf %119, %122 : vector<8x1xf32>
    %124 = math.rsqrt %123 : vector<8x1xf32>
    %125 = vector.broadcast %124 : vector<8x1xf32> to vector<8x32xf32>
    %126 = arith.mulf %121, %125 : vector<8x32xf32>
    %c0_65 = arith.constant 0 : index
    %c0_66 = arith.constant 0 : index
    %127 = vector.load %arg7[%c0_65, %c0_66] : memref<1x32xf32, #tpu.memory_space<vmem>>, vector<1x32xf32>
    %128 = vector.broadcast %127 : vector<1x32xf32> to vector<8x32xf32>
    %129 = arith.mulf %126, %128 : vector<8x32xf32>
    %c0_67 = arith.constant 0 : index
    %c0_68 = arith.constant 0 : index
    %130 = vector.load %arg8[%c0_67, %c0_68] : memref<1x32xf32, #tpu.memory_space<vmem>>, vector<1x32xf32>
    %131 = vector.broadcast %130 : vector<1x32xf32> to vector<8x32xf32>
    %132 = arith.addf %129, %131 : vector<8x32xf32>
    %133 = vector.shape_cast %132 : vector<8x32xf32> to vector<1x8x32xf32>
    %c0_69 = arith.constant 0 : index
    %c0_70 = arith.constant 0 : index
    %c0_71 = arith.constant 0 : index
    %134 = vector.load %arg9[%c0_69, %c0_70, %c0_71] : memref<1x8x32xf32, #tpu.memory_space<vmem>>, vector<1x8x32xf32>
    tpu.vector_store %arg9[%c0_69, %c0_70, %c0_71], %133 {strides = array<i32>} : memref<1x8x32xf32, #tpu.memory_space<vmem>>, vector<1x8x32xf32>,
    return
  }
  func.func @transform_0(%arg0: i32, %arg1: i32) -> (i32, i32, i32) {
    %c0_i32 = arith.constant 0 : i32
    %c0_i32_0 = arith.constant 0 : i32
    %c0_i32_1 = arith.constant 0 : i32
    return %arg0, %c0_i32, %c0_i32_0 : i32, i32, i32
  }
  func.func @transform_1(%arg0: i32, %arg1: i32) -> (i32, i32) {
    %c0_i32 = arith.constant 0 : i32
    %c0_i32_0 = arith.constant 0 : i32
    %c0_i32_1 = arith.constant 0 : i32
    return %c0_i32, %c0_i32_0 : i32, i32
  }
  func.func @transform_2(%arg0: i32, %arg1: i32) -> (i32, i32) {
    %c0_i32 = arith.constant 0 : i32
    %c0_i32_0 = arith.constant 0 : i32
    %c0_i32_1 = arith.constant 0 : i32
    return %c0_i32, %c0_i32_0 : i32, i32
  }
  func.func @transform_3(%arg0: i32, %arg1: i32) -> (i32, i32) {
    %c0_i32 = arith.constant 0 : i32
    %c0_i32_0 = arith.constant 0 : i32
    %c0_i32_1 = arith.constant 0 : i32
    return %c0_i32, %c0_i32_0 : i32, i32
  }
  func.func @transform_4(%arg0: i32, %arg1: i32) -> (i32, i32) {
    %c0_i32 = arith.constant 0 : i32
    %c0_i32_0 = arith.constant 0 : i32
    %c0_i32_1 = arith.constant 0 : i32
    return %c0_i32, %c0_i32_0 : i32, i32
  }
  func.func @transform_5(%arg0: i32, %arg1: i32) -> (i32, i32) {
    %c0_i32 = arith.constant 0 : i32
    %c0_i32_0 = arith.constant 0 : i32
    %c0_i32_1 = arith.constant 0 : i32
    return %c0_i32, %c0_i32_0 : i32, i32
  }
  func.func @transform_6(%arg0: i32, %arg1: i32) -> (i32, i32) {
    %c0_i32 = arith.constant 0 : i32
    %c0_i32_0 = arith.constant 0 : i32
    %c0_i32_1 = arith.constant 0 : i32
    return %c0_i32, %c0_i32_0 : i32, i32
  }
  func.func @transform_7(%arg0: i32, %arg1: i32) -> (i32, i32, i32) {
    %c0_i32 = arith.constant 0 : i32
    %c0_i32_0 = arith.constant 0 : i32
    return %arg0, %arg1, %c0_i32 : i32, i32, i32
  }
  func.func @transform_8(%arg0: i32, %arg1: i32) -> (i32, i32, i32, i32) {
    %c0_i32 = arith.constant 0 : i32
    %c0_i32_0 = arith.constant 0 : i32
    %c0_i32_1 = arith.constant 0 : i32
    return %arg0, %c0_i32, %arg1, %c0_i32_0 : i32, i32, i32, i32
  }
}

</mosaic_0001>

<bundles_post_ra>
// kernel: tpu_custom_call.1
= control target key start
LH: loop header
LB: loop body
LE: loop exit
PB: predicated region body
PF: predicated region fallthrough
CT: control target
= control target key end

     0   :  { %s1661_s0 = inlined_call_operand.hbm [shape: f32[2,8,32], index: 0, kind: input, shape index: {}]   ;;  %s1662_s1 = inlined_call_operand.hbm [shape: bf16[32,96], index: 1, kind: input, shape index: {}]   ;;  %s1663_s2 = inlined_call_operand.vmem [shape: f32[1,96], index: 2, kind: input, shape index: {}]   ;;  %s1664_s3 = inlined_call_operand.hbm [shape: bf16[32,32], index: 3, kind: input, shape index: {}]   ;;  %s1665_s4 = inlined_call_operand.vmem [shape: f32[1,32], index: 4, kind: input, shape index: {}]   ;;  %s1666_s5 = inlined_call_operand.vmem [shape: f32[1,32], index: 5, kind: input, shape index: {}]   ;;  %s1667_s6 = inlined_call_operand.vmem [shape: f32[1,32], index: 6, kind: input, shape index: {}]   ;;  %s1668_s7 = inlined_call_operand.hbm [shape: f32[2,8,32], index: 7, kind: output, shape index: {0}]   ;;  %s1669_s8 = inlined_call_operand.hbm [shape: bf16[2,4,8,8], index: 8, kind: output, shape index: {1}]  }
   0x1   :  { %1672 = sst [smem:[#allocation17_spill]] %s1661_s0 }
   0x2   :  { %1673 = sst [smem:[#allocation18_spill]] %s1662_s1 }
   0x3   :  { %1674 = sst [smem:[#allocation19_spill]] %s1663_s2 }
   0x4   :  { %1675 = sst [smem:[#allocation20_spill]] %s1664_s3 }
   0x5   :  { %14 = vsyncpa [#allocation5], 0 }
   0x6   :  { %16 = vsyncpa [#allocation5 + $0x1], 0 }
   0x7   :  { %17 = vsyncpa [#allocation8], 0 }
   0x8   :  { %18 = vsyncpa [#allocation6], 0 }
   0x9   :  { %20 = vsyncpa [#allocation6 + $0x1], 0 }
   0xa   :  { %21 = vsyncpa [#allocation12], 0 }
   0xb   :  { %23 = vsyncpa [#allocation12 + $0x1], 0  ;;  %s1428_s27 = smov 0   ;;  %s1430_s28 = smov 0  }
   0xc   :  { %s1432_s29 = smov 0   ;;  %s1434_s30 = smov 0  }
   0xd   :  { %s1436_s9 = smov 0   ;;  %s1438_s10 = smov 0  }
   0xe LB: > { %s968_s11 = sadd.s32 4294967295, %s1361_s10   ;;  %p970_p0 = scmp.ge.s32.totalorder %s1361_s10, 1  ;;  %s1361_s10 = sphi %s1438_s10, %s29_s10   ;;  %s1357_s9 = sphi %s1436_s9, %s1691_s9   ;;  %s1353_s30 = sphi %s1434_s30, %s1690_s30   ;;  %s1349_s29 = sphi %s1432_s29, %s1689_s29   ;;  %s1345_s28 = sphi %s1430_s28, %s1688_s28   ;;  %s1341_s27 = sphi %s1428_s27, %s1687_s27  }
   0xf   : > { %p1462_p1 = scmp.eq.s32.totalorder %s968_s11, 0  ;;  %p254_p2 = scmp.lt.s32.totalorder %s1361_s10, 3 }
  0x10   : > { %s1677_s1 = sld [smem:[#allocation18_spill]]  ;;  %s1363_s17 = smov [#allocation7]  }
  0x11   : > { %p1470_p3 = pnand %p970_p0, %p254_p2  ;;  %s267_s18 = sshll.u32 %s1363_s17, 4  ;;  %s268_s18 = int_to_ptr.vmem [resolvable:$true] %s267_s18 }
  0x12   : > { %p973_p6 = scmp.ge.s32.totalorder %s1361_s10, 2  ;;  %s1679_s3 = sld [smem:[#allocation20_spill]] }
  0x13   : > { %p1037_p4 = pneg %p1470_p3  ;;  %s1364_s22 = smov 64  }
  0x14   : > { %s1365_s23 = smov 4   ;;  %s1366_s24 = smov [#allocation9]  }
  0x15   : > { %p1038_p5 = pnand %p1037_p4, %p1462_p1  ;;  %s284_s25 = sshll.u32 %s1366_s24, 4  ;;  %s285_s25 = int_to_ptr.vmem [resolvable:$true] %s284_s25 }
  0x16   : > { %s265_s15 = sshll.u32 %s1677_s1, 4  ;;  %s41_s26 = sadd.s32 1, %s1357_s9  ;;  %s266_s15 = int_to_ptr.hbm [resolvable:$true] %s265_s15 }
  0x17   : > { %1040 = dma.hbm_to_vmem [thread:$0]  (!%p1038_p5), %s266_s15, 256, %s268_s18, [#allocation8], %s1364_s22, %s1364_s22, %s1365_s23  }
  0x18   : > { %s282_s21 = sshll.u32 %s1679_s3, 4  ;;  %s969_s13 = sadd.s32 4294967294, %s1361_s10   ;;  %s283_s21 = int_to_ptr.hbm [resolvable:$true] %s282_s21 }
  0x19   : > { %1043 = dma.hbm_to_vmem [thread:$0]  (!%p1038_p5), %s283_s21, 256, %s285_s25, [#allocation8], %s1364_s22, %s1364_s22, %s1365_s23  }
  0x1a   : > { %p43_p7 = scmp.ge.s32.totalorder %s41_s26, 2  ;;  %s48_s14 = sadd.s32 1, %s1349_s29 }
  0x1b   : > { %p55_p8 = scmp.ne.s32.totalorder %s1349_s29, %s1345_s28  ;;  %p56_p9 = scmp.eq.s32.totalorder %s1361_s10, 0 }
  0x1c   : > { %s1693_s26 = smov (%p43_p7, %s41_s26), 0  ;;  %p61_p10 = scmp.ne.s32.totalorder %s1345_s28, %s1341_s27 }
  0x1d   : > { %s45_s15 = ssub.s32 %s1357_s9, %s1693_s26  ;;  %p213_p11 = scmp.eq.s32.totalorder %s968_s11, 1 }
  0x1e   : > { %p46_p12 = scmp.eq.s32.totalorder %s45_s15, 0  ;;  %p1498_p13 = por %p1462_p1, %p61_p10 }
  0x1f   : > { %p1502_p0 = por %p213_p11, %p55_p8  ;;  %p219_p2 = scmp.eq.s32.totalorder %s969_s13, 1 }
  0x20   : > { %s1507_s19 = scalar_select %p46_p12, %s1349_s29, %s48_s14  }
  0x21   : > { %p57_p4 = por %p56_p9, %p55_p8  ;;  %p1509_p5 = por %p219_p2, %p61_p10 }
  0x22   : > { %s307_s21 = sand.u32 1, %s1349_s29   ;;  %s975_s11 = sshll.u32 %s1357_s9, 3 }
  0x23   : > { %p1057_p7 = scmp.lt.s32.totalorder %s1361_s10, 2  ;;  %s974_s22 = sshll.u32 %s307_s21, 3 }
  0x24   : > { %s1683_s0 = sld [smem:[#allocation17_spill]]  ;;  %s311_s1 = scalar_lea.vmem [#allocation4], %s974_s22 }
  0x25   : > { %s319_s3 = sshll.u32 %s311_s1, 4  ;;  %p1045_p11 = pnand %p1057_p7, %p57_p4  ;;  %s320_s3 = int_to_ptr.vmem [resolvable:$true] %s319_s3 }
  0x26   : > { %s308_s13 = scalar_lea.sflag [#allocation5], %s307_s21  ;;  %s1522_s14 = sand.u32 (!%p1470_p3), 1, %s1345_s28  }
  0x27   : > { %s1670_s23 = sshll.u32 (!%p1470_p3), %s1522_s14, 3 }
  0x28   : > { %328 = sbr.rel (%p1470_p3) target bundleno = 1407 (0x57f), region = 48  ;;  %s334_s22 = scalar_lea.vmem (!%p1470_p3), [#allocation4], %s1670_s23 }
  0x2a   : > { %s315_s25 = scalar_lea.hbm %s1683_s0, %s975_s11  ;;  %s331_s11 = scalar_lea.sflag (!%p1470_p3), [#allocation5], %s1522_s14 }
  0x2b   : > { %s317_s15 = sshll.u32 %s315_s25, 4  ;;  %s318_s15 = int_to_ptr.hbm [resolvable:$true] %s317_s15 }
  0x2c   : > { %1047 = dma.hbm_to_vmem [thread:$0]  (!%p1045_p11), %s318_s15, 128, %s320_s3, %s308_s13  }
  0x2d   : > { %1324 = dma.done.wait (%p1498_p13), %s331_s11, 128  }
  0x2e   : > { %1326 = vsyncadd (%p1498_p13), %s331_s11, 4294967168 }
  0x2f   : > { %1328 = dma.done.wait (%p1462_p1), [#allocation8], 512  }
  0x30   : > { %1330 = vsyncadd (%p1462_p1), [#allocation8], 4294966784  ;;  %v1019_v0 = vld [vmem:[#allocation7 + $0x8] sm:$0xff]  ;;  %v1018_v1 = vld [vmem:[#allocation7] sm:$0xff]  ;;  %vm410_vm0 = vcmask 261120   ;;  %s1684_s2 = sld [smem:[#allocation19_spill]] }
  0x31   : > { %420 = vmatpush.bf16.msra.mxu0 %v1019_v0  ;;  %v1536_v2 = vld [vmem:[%s334_s22] sm:$0xff]  ;;  %vm428_vm1 = vcmask 781312   ;;  %s1367_s12 = smov 96   ;;  %s1368_s16 = smov 104   ;;  %vm442_vm2 = vcmask 64512   ;;  %vm481_vm3 = vcmask 1043456  }
  0x32   : > { %v389_v3 = vpack.c.bf16 %v1536_v2, %v1536_v2  ;;  %s1369_s17 = smov 120   ;;  %s1370_s21 = smov 88   ;;  %vm474_vm4 = vcmask 60416   ;;  %vm570_vm5 = vcmask 126016   ;;  %vm639_vm6 = vcmask 191616  }
  0x33   : > { %s1371_s24 = smov 80   ;;  %s1372_s25 = smov 72   ;;  %vm708_vm7 = vcmask 257216  }
  0x34   : > { %s1373_s15 = smov 112   ;;  %s1671_s13 = smov 64  }
  0x35   : > { %421 = vmatpush.bf16.msra.mxu0 %v1018_v1  ;;  %s1375_s11 = smov 40   ;;  %s1376_s22 = smov 56  }
  0x36   : > { %v1129_v4 = vld [vmem:[%s1684_s2] ss:$0 sm:$0xff]  ;;  %s1377_s1 = smov 48   ;;  %s981_s3 = sshll.u32 %s1522_s14, 4 }
  0x38   : > { %990 = vmatmul.msk.bf16.vlgmr.msra.gmra.mxu0 %vm410_vm0, %v389_v3 }
  0xb5   : > { %v423_v5 = vpop.f32.mrf.mxu0 }
  0xb6   : > { %v424_v6 = vadd.f32 %v1129_v4, %v423_v5 }
  0xb8   : > { %v427_v7 = vpack.c.bf16 %v424_v6, %v424_v6 }
  0xba   : > { %429 = vst.msk [vmem:[#allocation2] sm:$0xf] %vm428_vm1, %v427_v7 }
  0xbd   : > { %v425_v8 = vpop.f32.mrf.mxu0 }
  0xc1   : > { %v436_v9 = vld [vmem:[#allocation2] sm:$0xf] }
  0xc2   : > { %v435_v10 = vld [vmem:[#allocation2] sm:$0xf]  ;;  %v438_v11 = vunpack.c.l.b16 %v436_v9 }
  0xc3   : > { %v502_v12 = vunpack.c.l.b16 %v435_v10  ;;  %v500_v15 = vld [vmem:[#allocation2] sm:$0xf] }
  0xc4   : > { %v439_v13 = vpack.c.b16 %v438_v11, %v438_v11  ;;  %v572_v16 = vld [vmem:[#allocation2] sm:$0xf]  ;;  %v507_v18 = vunpack.c.l.b16 %v500_v15 }
  0xc5   : > { %v503_v14 = vpack.c.b16 %v502_v12, %v502_v12  ;;  %v641_v17 = vld [vmem:[#allocation2] sm:$0xf]  ;;  %v576_v19 = vunpack.c.l.b16 %v572_v16 }
  0xc6   : > { %440 = vrot.lane.b32.xlu0 %v439_v13, %s1367_s12  ;;  %v645_v20 = vunpack.c.l.b16 %v641_v17  ;;  %v1544_v21 = vpack.c.b16 %v507_v18, %v507_v18  ;;  %s1572_s12 = scalar_lea.vmem [#allocation11], %s981_s3 }
  0xc7   : > { %642 = vrot.lane.b32.xlu2 %v503_v14, %s1368_s16  ;;  %504 = vrot.lane.b32.xlu1 %v503_v14, %s1369_s17  ;;  %v1546_v22 = vpack.c.b16 %v576_v19, %v576_v19  ;;  %s1378_s16 = smov 8   ;;  %s1379_s17 = smov 16  }
  0xc8   : > { %v646_v23 = vpack.c.b16 %v645_v20, %v645_v20  ;;  %s825_s3 = sshll.u32 %s1572_s12, 4  ;;  %s826_s3 = int_to_ptr.vmem [resolvable:$true] %s825_s3 }
  0xce   : > { %509 = vrot.lane.b32.xlu0 %v1544_v21, %s1370_s21  ;;  %s1380_s21 = smov 24  }
  0xcf   : > { %578 = vrot.lane.b32.xlu2 %v1546_v22, %s1371_s24  ;;  %647 = vrot.lane.b32.xlu1 %v646_v23, %s1372_s25 }
  0xd6   : > { %573 = vrot.lane.b32.xlu0 %v503_v14, %s1373_s15  ;;  %s1022_s15 = sshll.u32 %s1353_s30, 4 }
 0x121   : > { %v643_v24 = vpop.permute.xlu2 %642 }
 0x129   : > { %v579_v25 = vpop.permute.xlu2 %578 }
 0x12a   : > { %v584_v26 = vsel %vm442_vm2, %v579_v25, 0 }
 0x12b   : > { %593 = vmatpush.bf16.xpose.msrb.mxu0 %v584_v26 }
 0x138   : > { %v441_v27 = vpop.permute.xlu0 %440 }
 0x139   : > { %v505_v28 = vpop.permute.xlu1 %504  ;;  %v447_v29 = vsel %vm442_vm2, %v441_v27, 0 }
 0x13a   : > { %456 = vmatpush.bf16.xpose.msra.mxu1 %v447_v29 }
 0x140   : > { %v510_v30 = vpop.permute.xlu0 %509 }
 0x141   : > { %v648_v31 = vpop.permute.xlu1 %647  ;;  %991 = vmatmul.msk.bf16.vlgmr.msra.gmra.mxu1 %vm442_vm2, %v435_v10  ;;  %v515_v32 = vsel %vm442_vm2, %v510_v30, 0 }
 0x142   : > { %524 = vmatpush.bf16.xpose.msra.mxu3 %v515_v32  ;;  %v653_v33 = vsel %vm442_vm2, %v648_v31, 0 }
 0x148   : > { %v574_v34 = vpop.permute.xlu0 %573 }
 0x149   : > { %993 = vmatmul.msk.bf16.vlgmr.msra.gmra.mxu3 %vm442_vm2, %v505_v28  ;;  %996 = vmatmul.msk.bf16.vlgmr.msrb.gmra.mxu0 %vm442_vm2, %v574_v34 }
 0x14a   : > { %662 = vmatpush.bf16.xpose.msrb.mxu3 %v653_v33 }
 0x159   : > { %999 = vmatmul.msk.bf16.vlgmr.msrb.gmra.mxu3 %vm442_vm2, %v643_v24 }
 0x1be   : > { %v458_v35 = vpop.f32.mrf.mxu1 }
 0x1bf   : > { %v462_v36 = vsel %vm442_vm2, %v458_v35, -inf }
 0x1c0   : > { %463 = vmax.xlane.f32.xlu1 %v462_v36 }
 0x1c6   : > { %v460_v37 = vpop.f32.mrf.mxu1  ;;  %v595_v38 = vpop.f32.mrf.mxu0 }
 0x1c7   : > { %v599_v43 = vsel %vm442_vm2, %v595_v38, -inf }
 0x1cc   : > { %v526_v39 = vpop.f32.mrf.mxu3 }
 0x1cd   : > { %v530_v40 = vsel %vm442_vm2, %v526_v39, -inf }
 0x1ce   : > { %v597_v41 = vpop.f32.mrf.mxu0  ;;  %531 = vmax.xlane.f32.xlu2 %v530_v40  ;;  %v1021_v40 = vld [vmem:[#allocation9 + $0x8] sm:$0xff] }
 0x1cf   : > { %741 = vmatpush.bf16.msra.mxu0 %v1021_v40  ;;  %v1020_v41 = vld [vmem:[#allocation9] sm:$0xff] }
 0x1d3   : > { %742 = vmatpush.bf16.msra.mxu0 %v1020_v41 }
 0x1d4   : > { %v528_v42 = vpop.f32.mrf.mxu3 }
 0x1d6   : > { %600 = vmax.xlane.f32.xlu2 %v599_v43 }
 0x1dc   : > { %v664_v44 = vpop.f32.mrf.mxu3 }
 0x1dd   : > { %v668_v45 = vsel %vm442_vm2, %v664_v44, -inf }
 0x1de   : > { %669 = vmax.xlane.f32.xlu0 %v668_v45 }
 0x1e4   : > { %v666_v46 = vpop.f32.mrf.mxu3 }
 0x1e5   : > { %v1130_v46 = vld [vmem:[%s1665_s4] ss:$0 sm:$0xff] }
 0x1ee   : > { %476 = vrot.lane.b32.xlu2 %v439_v13, %s1671_s13  ;;  %s1263_s13 = scalar_lea.hbm %s1669_s8, 32 }
 0x1f6   : > { %682 = vrot.lane.b32.xlu2 %v646_v23, %s1375_s11 }
 0x233   : > { %v464_v47 = vpop.xlane.xlu1 %463 }
 0x234   : > { %v465_v48 = vsub.f32 %v458_v35, %v464_v47 }
 0x236   : > { %v466_v49 = vmul.f32 1.442695, %v465_v48 }
 0x238   : > { %1133 = vpow2.f32 %v466_v49 }
 0x23e   : > { %v1134_v50 = vpop.eup %1133 }
 0x23f   : > { %v468_v51 = vsel %vm442_vm2, %v1134_v50, 0.0 }
 0x240   : > { %469 = vadd.xlane.f32.xlu1 %v468_v51 }
 0x241   : > { %v532_v52 = vpop.xlane.xlu2 %531 }
 0x242   : > { %v533_v55 = vsub.f32 %v526_v39, %v532_v52  ;;  %v1381_v52 = vmov 32.0  }
 0x244   : > { %v534_v57 = vmul.f32 1.442695, %v533_v55 }
 0x249   : > { %v601_v53 = vpop.xlane.xlu2 %600 }
 0x24a   : > { %v602_v54 = vsub.f32 %v595_v38, %v601_v53 }
 0x24c   : > { %v603_v56 = vmul.f32 1.442695, %v602_v54 }
 0x24e   : > { %1135 = vpow2.f32 %v603_v56 }
 0x24f   : > { %1137 = vpow2.f32 %v534_v57 }
 0x251   : > { %v477_v58 = vpop.permute.xlu2 %476  ;;  %v670_v59 = vpop.xlane.xlu0 %669 }
 0x252   : > { %v483_v60 = vsel %vm481_vm3, %v477_v58, 0  ;;  %v671_v62 = vsub.f32 %v664_v44, %v670_v59 }
 0x253   : > { %492 = vmatpush.bf16.msra.mxu2 %v483_v60 }
 0x254   : > { %v1136_v61 = vpop.eup %1135  ;;  %v672_v0 = vmul.f32 1.442695, %v671_v62 }
 0x255   : > { %v605_v63 = vsel %vm442_vm2, %v1136_v61, 0.0  ;;  %v1138_v1 = vpop.eup %1137 }
 0x256   : > { %606 = vadd.xlane.f32.xlu0 %v605_v63  ;;  %1139 = vpow2.f32 %v672_v0  ;;  %v536_v3 = vsel %vm442_vm2, %v1138_v1, 0.0 }
 0x259   : > { %544 = vrot.lane.b32.xlu1 %v1544_v21, %s1376_s22  ;;  %v683_v11 = vpop.permute.xlu2 %682 }
 0x25a   : > { %v688_v14 = vsel %vm481_vm3, %v683_v11, 0 }
 0x25c   : > { %v1140_v4 = vpop.eup %1139 }
 0x25d   : > { %v674_v5 = vsel %vm442_vm2, %v1140_v4, 0.0 }
 0x25e   : > { %537 = vadd.xlane.f32.xlu0 %v536_v3 }
 0x266   : > { %675 = vadd.xlane.f32.xlu0 %v674_v5 }
 0x27a   : > { %613 = vrot.lane.b32.xlu0 %v1546_v22, %s1377_s1  ;;  %s824_s1 = scalar_lea.hbm %s1669_s8, %s1022_s15 }
 0x2b3   : > { %v470_v6 = vpop.xlane.xlu1 %469 }
 0x2b4   : > { %1141 = vrcp.f32 %v470_v6 }
 0x2ba   : > { %v1142_v7 = vpop.eup %1141 }
 0x2bb   : > { %v472_v8 = vmul.f32 %v1142_v7, %v1134_v50 }
 0x2bd   : > { %v473_v9 = vpack.c.bf16 %v472_v8, %v472_v8 }
 0x2bf   : > { %992 = vmatmul.msk.bf16.vlgmr.msra.gmra.mxu2 %vm442_vm2, %v473_v9  ;;  %475 = vst.msk [vmem:[%s1572_s12] sm:$0xf] %vm474_vm4, %v473_v9 }
 0x2c9   : > { %v607_v10 = vpop.xlane.xlu0 %606 }
 0x2ca   : > { %1143 = vrcp.f32 %v607_v10 }
 0x2cb   : > { %v545_v12 = vpop.permute.xlu1 %544 }
 0x2cc   : > { %v550_v13 = vsel %vm481_vm3, %v545_v12, 0 }
 0x2cd   : > { %559 = vmatpush.bf16.msrb.mxu2 %v550_v13 }
 0x2d0   : > { %v1144_v15 = vpop.eup %1143 }
 0x2d1   : > { %697 = vmatpush.bf16.msra.mxu2 %v688_v14  ;;  %v609_v16 = vmul.f32 %v1144_v15, %v1136_v61  ;;  %v538_v17 = vpop.xlane.xlu0 %537 }
 0x2d2   : > { %1145 = vrcp.f32 %v538_v17 }
 0x2d3   : > { %v610_v18 = vpack.c.bf16 %v609_v16, %v609_v16 }
 0x2d5   : > { %997 = vst.msk [vmem:[%s1572_s12 + $0x8] sm:$0xf] %vm474_vm4, %v610_v18 }
 0x2d8   : > { %v1146_v19 = vpop.eup %1145 }
 0x2d9   : > { %v540_v20 = vmul.f32 %v1146_v19, %v1138_v1  ;;  %v676_v21 = vpop.xlane.xlu0 %675 }
 0x2da   : > { %1147 = vrcp.f32 %v676_v21 }
 0x2db   : > { %v541_v22 = vpack.c.bf16 %v540_v20, %v540_v20  ;;  %1149 = vrcp.f32 %v1381_v52 }
 0x2dd   : > { %995 = vmatmul.msk.bf16.vlgmr.msrb.gmra.mxu2 %vm442_vm2, %v541_v22  ;;  %994 = vst.msk [vmem:[%s1572_s12 + $0x4] sm:$0xf] %vm474_vm4, %v541_v22 }
 0x2e0   : > { %v1148_v23 = vpop.eup %1147 }
 0x2e1   : > { %v678_v24 = vmul.f32 %v1148_v23, %v1140_v4  ;;  %v1150_v53 = vpop.eup %1149 }
 0x2e2   : > { %v755_v54 = vmul.f32 32.0, %v1150_v53  ;;  %vm759_vm8 = vweird.f32 %v1150_v53 }
 0x2e3   : > { %v679_v25 = vpack.c.bf16 %v678_v24, %v678_v24 }
 0x2e4   : > { %v756_v55 = vsub.f32 1.0, %v755_v54 }
 0x2e5   : > { %1000 = vst.msk [vmem:[%s1572_s12 + $0xc] sm:$0xf] %vm474_vm4, %v679_v25 }
 0x2e6   : > { %v757_v56 = vmul.f32 %v1150_v53, %v756_v55 }
 0x2e8   : > { %v758_v57 = vadd.f32 %v1150_v53, %v757_v56 }
 0x2ea   : > { %v760_v58 = vsel %vm759_vm8, %v1150_v53, %v758_v57 }
 0x2ec   : > { %v614_v26 = vpop.permute.xlu0 %613 }
 0x2ed   : > { %1001 = vmatmul.msk.bf16.vlgmr.msra.gmra.mxu2 %vm442_vm2, %v679_v25  ;;  %v619_v27 = vsel %vm481_vm3, %v614_v26, 0 }
 0x2ee   : > { %628 = vmatpush.bf16.msrb.mxu1 %v619_v27 }
 0x2f1   : > { %998 = vmatmul.msk.bf16.vlgmr.msrb.gmra.mxu1 %vm442_vm2, %v610_v18 }
 0x342   : > { %v494_v28 = vpop.f32.mrf.mxu2 }
 0x343   : > { %v498_v29 = vpack.c.bf16 %v494_v28, %v494_v28 }
 0x345   : > { %499 = vst.msk [vmem:[#allocation3] sm:$0xf] %vm474_vm4, %v498_v29 }
 0x34a   : > { %v496_v30 = vpop.f32.mrf.mxu2 }
 0x360   : > { %v561_v31 = vpop.f32.mrf.mxu2 }
 0x361   : > { %v565_v32 = vpack.c.bf16 %v561_v31, %v561_v31 }
 0x363   : > { %567 = vrot.lane.b32.xlu1 %v565_v32, %s1378_s16  ;;  %s827_s16 = sshll.u32 %s824_s1, 4  ;;  %s828_s16 = int_to_ptr.hbm [resolvable:$true] %s827_s16 }
 0x368   : > { %v563_v33 = vpop.f32.mrf.mxu2 }
 0x36e   : > { %v630_v34 = vpop.f32.mrf.mxu1 }
 0x36f   : > { %v634_v35 = vpack.c.bf16 %v630_v34, %v630_v34 }
 0x370   : > { %v699_v36 = vpop.f32.mrf.mxu2 }
 0x371   : > { %v703_v37 = vpack.c.bf16 %v699_v36, %v699_v36  ;;  %636 = vrot.lane.b32.xlu2 %v634_v35, %s1379_s17  ;;  %s797_s17 = scalar_lea.sflag [#allocation12], %s1522_s14 }
 0x373   : > { %705 = vrot.lane.b32.xlu1 %v703_v37, %s1380_s21  ;;  %s1257_s21 = sshra.s32 %s828_s16, 4  ;;  %s1258_s21 = int_to_ptr.hbm [resolvable:$true] %s1257_s21 }
 0x374   : > { %s1259_s24 = scalar_lea.hbm %s1258_s21, 16  ;;  %p1264_p9 = scmp.lt.s32.totalorder %s1258_s21, %s1669_s8 }
 0x375   : > { %p1260_p1 = scmp.ne.s32.totalorder %s1258_s21, %s1259_s24  ;;  %p1265_p10 = scmp.lt.s32.totalorder %s1263_s13, %s1259_s24 }
 0x376   : > { %v632_v38 = vpop.f32.mrf.mxu1 }
 0x377   : > { %p1261_p3 = pnand %p1260_p1, %p1502_p0  ;;  %p1266_p12 = por %p1265_p10, %p1264_p9 }
 0x378   : > { %v701_v39 = vpop.f32.mrf.mxu2 }
 0x379   : > { %p1262_p8 = pneg %p1261_p3 }
 0x37b   : > { %p1267_p13 = pnand %p1266_p12, %p1262_p8 }
 0x3cb   : > { %v637_v43 = vpop.permute.xlu2 %636 }
 0x3d5   : > { %v568_v42 = vpop.permute.xlu1 %567 }
 0x3d6   : > { %571 = vst.msk [vmem:[#allocation3] sm:$0xf] %vm570_vm5, %v568_v42 }
 0x3d7   : > { %640 = vst.msk [vmem:[#allocation3] sm:$0xf] %vm639_vm6, %v637_v43 }
 0x3e5   : > { %v706_v44 = vpop.permute.xlu1 %705 }
 0x3e6   : > { %709 = vst.msk [vmem:[#allocation3] sm:$0xf] %vm708_vm7, %v706_v44 }
 0x3ed   : > { %v710_v45 = vld [vmem:[#allocation3] sm:$0xf] }
 0x3ee   : > { %1010 = vmatmul.msk.bf16.vlgmr.msra.gmra.mxu0 %vm410_vm0, %v710_v45 }
 0x46b   : > { %v744_v47 = vpop.f32.mrf.mxu0 }
 0x46c   : > { %v745_v48 = vadd.f32 %v1130_v46, %v744_v47 }
 0x46e   : > { %v750_v49 = vadd.f32 %v745_v48, %v1536_v2 }
 0x470   : > { %v751_v50 = vsel %vm410_vm0, %v750_v49, 0.0 }
 0x471   : > { %752 = vadd.xlane.f32.xlu2 %v751_v50 }
 0x473   : > { %v746_v51 = vpop.f32.mrf.mxu0 }
 0x4e4   : > { %v753_v59 = vpop.xlane.xlu2 %752 }
 0x4e5   : > { %v761_v60 = vmul.f32 %v760_v58, %v753_v59 }
 0x4e7   : > { %v762_v2 = vsub.f32 %v750_v49, %v761_v60 }
 0x4e9   : > { %v763_v61 = vmul.f32 %v762_v2, %v762_v2 }
 0x4eb   : > { %v764_v62 = vsel %vm410_vm0, %v763_v61, 0.0 }
 0x4ec   : > { %765 = vadd.xlane.f32.xlu1 %v764_v62 }
 0x4ed   : > { %1270 = shalt.err (!%p1267_p13)
}
 0x4ee   : > { %s1382_s12 = smov 4   ;;  %s1685_s15 = smov 64   ;;  %v1131_v9 = vld [vmem:[%s1666_s5] ss:$0 sm:$0xff] }
 0x4ef   : > { %1034 = dma.vmem_to_hbm [thread:$0]  (%p1502_p0), %s826_s3, 256, %s828_s16, %s797_s17, %s1685_s15, %s1685_s15, %s1382_s12  }
 0x4f0   : > { %s1013_s0 = sshll.u32 %s1353_s30, 3  ;;  %v1132_v12 = vld [vmem:[%s1667_s6] ss:$0 sm:$0xff]  ;;  %s1686_s30 = sshll.u32 %s1522_s14, 3 }
 0x4f1   : > { %s808_s22 = scalar_lea.hbm %s1668_s7, %s1013_s0  ;;  %s375_s16 = scalar_lea.vmem [#allocation10], %s1686_s30 }
 0x4f2   : > { %s810_s17 = sshll.u32 %s375_s16, 4  ;;  %s812_s21 = sshll.u32 %s808_s22, 4  ;;  %s811_s17 = int_to_ptr.vmem [resolvable:$true] %s810_s17  ;;  %s813_s21 = int_to_ptr.hbm [resolvable:$true] %s812_s21 }
 0x4f3   : > { %s792_s24 = scalar_lea.sflag [#allocation6], %s1522_s14  ;;  %s1285_s25 = sshra.s32 %s813_s21, 4  ;;  %s1286_s25 = int_to_ptr.hbm [resolvable:$true] %s1285_s25 }
 0x4f4   : > { %s1287_s12 = scalar_lea.hbm %s1286_s25, 8  ;;  %s1291_s2 = scalar_lea.hbm %s1668_s7, 16 }
 0x4f5   : > { %p1288_p2 = scmp.ne.s32.totalorder %s1286_s25, %s1287_s12  ;;  %p1292_p11 = scmp.lt.s32.totalorder %s1286_s25, %s1668_s7 }
 0x4f6   : > { %p1293_p1 = scmp.lt.s32.totalorder %s1291_s2, %s1287_s12 }
 0x4f7   : > { %p1289_p4 = pnand %p1288_p2, %p1502_p0 }
 0x4f8   : > { %p1294_p3 = por %p1293_p1, %p1292_p11 }
 0x4f9   : > { %p1290_p7 = pneg %p1289_p4 }
 0x4fb   : > { %p1295_p8 = pnand %p1294_p3, %p1290_p7 }
 0x55f   : > { %v766_v63 = vpop.xlane.xlu1 %765 }
 0x560   : > { %v767_v0 = vmul.f32 %v766_v63, %v760_v58 }
 0x562   : > { %v768_v1 = vadd.f32 1e-05, %v767_v0 }
 0x564   : > { %1151 = vrsqrt.f32 %v768_v1  ;;  %vm775_vm10 = vweird.f32 %v768_v1 }
 0x56a   : > { %v1152_v3 = vpop.eup %1151 }
 0x56b   : > { %v770_v4 = vmul.f32 %v1152_v3, %v768_v1  ;;  %vm776_vm9 = vweird.f32 %v1152_v3 }
 0x56c   : > { %vm777_vm11 = vmor %vm775_vm10, %vm776_vm9 }
 0x56d   : > { %v771_v5 = vmul.f32 %v1152_v3, %v770_v4 }
 0x56f   : > { %v772_v6 = vmul.f32 0.5, %v771_v5 }
 0x571   : > { %v773_v7 = vsub.f32 1.5, %v772_v6 }
 0x573   : > { %v774_v8 = vmul.f32 %v1152_v3, %v773_v7 }
 0x575   : > { %v778_v10 = vsel %vm777_vm11, %v1152_v3, %v774_v8 }
 0x576   : > { %v779_v11 = vmul.f32 %v778_v10, %v762_v2 }
 0x578   : > { %v784_v13 = vmul.f32 %v1131_v9, %v779_v11 }
 0x57a   : > { %v789_v14 = vadd.f32 %v1132_v12, %v784_v13 }
 0x57c   : > { %790 = vst.msk [vmem:[%s375_s16] sm:$0xff] %vm410_vm0, %v789_v14 }
 0x57d   : > { %1298 = shalt.err (!%p1295_p8)
}
 0x57e   : > { %1033 = dma.vmem_to_hbm [thread:$0]  (%p1502_p0), %s811_s17, 128, %s813_s21, %s792_s24  }
 0x57f PF: > { %s842_s14 = sand.u32 1, %s1341_s27   ;;  %p1049_p9 = pnand %p973_p6, %p1509_p5 }
 0x580   : > { %s843_s11 = scalar_lea.sflag [#allocation6], %s842_s14 }
 0x581   : > { %p1050_p10 = pneg %p1049_p9 }
 0x583   : > { %1332 = dma.done.wait (%p1050_p10), %s843_s11, 128  }
 0x584   : > { %1334 = vsyncadd (%p1050_p10), %s843_s11, 4294967168  ;;  %s853_s22 = scalar_lea.sflag [#allocation12], %s842_s14 }
 0x585   : > { %1336 = dma.done.wait (%p1050_p10), %s853_s22, 256  }
 0x586   : > { %1338 = vsyncadd (%p1050_p10), %s853_s22, 4294967040  ;;  %s29_s10 = sadd.s32 1, %s1361_s10   ;;  %s1687_s27 = smov %s1345_s28 }
 0x587   : > { %p26_p12 = scmp.ge.s32.totalorder %s29_s10, 4   ;;  %s1688_s28 = smov %s1349_s29 }
 0x588   : > { %s1689_s29 = smov %s1507_s19  ;;  %s1690_s30 = smov %s1357_s9 }
 0x589   : > { %s1691_s9 = smov %s1693_s26  ;;  %28 = sbr.rel (!%p26_p12) target bundleno = 14 (0xe), region = 127 }
 0x58e   :  { %859 = vsyncpa [#allocation5], 1 }
 0x58f   :  { %861 = vsyncpa [#allocation5 + $0x1], 1 }
 0x590   :  { %862 = vsyncpa [#allocation8], 1 }
 0x591   :  { %863 = vsyncpa [#allocation6], 1 }
 0x592   :  { %865 = vsyncpa [#allocation6 + $0x1], 1 }
 0x593   :  { %866 = vsyncpa [#allocation12], 1 }
 0x594   :  { %868 = vsyncpa [#allocation12 + $0x1], 1 }

</bundles_post_ra>
